<compile_context>
chip_gen: v7x
topology: tpu7x:2x2x1
jax: 0.10.0
libtpu: 0.0.40
codegen_flags: <defaults>
</compile_context>

<pallas_src>
import numpy as np
import jax
import jax.numpy as jnp
from jax import lax
from jax.experimental import pallas as pl
from jax.experimental.pallas import tpu as pltpu

# ---------------- configuration (small shapes consistent with the module) ----------------
B = 2                       # batch
IN_C = 4                    # input channels
L = 16                      # sequence length
KERNEL_SIZES = (3, 3)
STRIDES = (2, 1)
OUT_CHANNELS = (8, 16)
EPS = 1e-5

C1, C2 = OUT_CHANNELS
K1, K2 = KERNEL_SIZES
S1, S2 = STRIDES
P1, P2 = K1 // 2, K2 // 2
L1 = (L + 2 * P1 - K1) // S1 + 1      # length after conv1 (= length of f)
L2 = (L1 + 2 * P2 - K2) // S2 + 1     # final length
assert L1 == L2, "residual add in the PyTorch module requires matching lengths"
assert S2 == 1, "rolled-tap conv2 assumes unit stride"

R = B * L1                 # rows of every post-conv1 activation
W = 32                     # slab lane width (everything pads to 128 lanes in VMEM anyway)
assert W >= max(2 * K1 * IN_C + 2, C1 + C2, C2, IN_C)

# slab row layout (each logical block starts on a sublane-group boundary)
ROW_X  = 0                 # B*L  rows: raw x, channels-last (for BN0 statistics)
ROW_A1 = ROW_X + B * L     # R    rows: conv1 stride-S1 im2col of raw x + static masks
ROW_P  = ROW_A1 + R        # 8    rows: parameter vectors
ROW_W1 = ROW_P + 8         # 16   rows: conv1 weight (upsample folded), K1*IN_C used
ROW_W2 = ROW_W1 + 16       # K2*C1 rows: conv2 weight
NROWS  = ROW_W2 + K2 * C1  # 96
COL_M2A = 2 * K1 * IN_C        # conv2 tap-0 validity mask column
COL_M2B = 2 * K1 * IN_C + 1    # conv2 tap-2 validity mask column


# ------------------- static (trace-time, numpy) mask block for the A1 rows -------------------
def _static_mask_block():
    l = np.arange(R) % L1
    # conv1: zero the BN shift term wherever the stride-S1 im2col read zero padding
    m1 = np.zeros((R, K1 * IN_C), np.float32)
    for t in range(K1):
        src = l * S1 - P1 + t
        m1[:, t * IN_C:(t + 1) * IN_C] = ((src >= 0) & (src < L)).astype(np.float32)[:, None]
    # conv2 rolled taps: zero rows whose shifted source crosses a batch boundary / padding
    m2a = (l > 0).astype(np.float32)[:, None]         # tap 0 reads l-1
    m2b = (l < L1 - 1).astype(np.float32)[:, None]    # tap 2 reads l+1
    blk = np.concatenate([m1, m2a, m2b], axis=1)
    return np.pad(blk, ((0, 0), (0, W - K1 * IN_C - blk.shape[1])))   # (R, W - K1*IN_C)


A1_MASK_NP = _static_mask_block()


# ------------------------------------ kernel helpers ------------------------------------
def _bn_affine(v, gamma, beta, inv_n):
    # nn.BatchNorm1d training-mode forward: per-channel stats over all rows (= (batch,len)),
    # biased variance; returned as an affine (scale, shift) pair.  Means via sum * (1/N).
    # TODO(synk): eval-mode (running_mean / running_var) path is not implemented.
    mu = jnp.sum(v, axis=0, keepdims=True) * inv_n
    d = v - mu
    var = jnp.sum(d * d, axis=0, keepdims=True) * inv_n
    scale = lax.rsqrt(var + EPS) * gamma
    return scale, beta - mu * scale


# ---------------------------------------- kernel ----------------------------------------
def msp_kernel(slab_ref, out_ref):
    # ---- unpack the single slab with static row/col windows ----
    x2d    = slab_ref[ROW_X:ROW_X + B * L, :IN_C]                    # (B*L, IN_C)
    a1_raw = slab_ref[ROW_A1:ROW_A1 + R, :K1 * IN_C]                  # (R, K1*IN_C)
    pmask1 = slab_ref[ROW_A1:ROW_A1 + R, K1 * IN_C:2 * K1 * IN_C]     # (R, K1*IN_C)
    m2a    = slab_ref[ROW_A1:ROW_A1 + R, COL_M2A:COL_M2A + 1]         # (R, 1)
    m2b    = slab_ref[ROW_A1:ROW_A1 + R, COL_M2B:COL_M2B + 1]         # (R, 1)
    g0   = slab_ref[ROW_P + 0:ROW_P + 1, :IN_C]
    b0   = slab_ref[ROW_P + 1:ROW_P + 2, :IN_C]
    cb1e = slab_ref[ROW_P + 2:ROW_P + 3, :C1 + C2]
    g1   = slab_ref[ROW_P + 3:ROW_P + 4, :C1]
    b1   = slab_ref[ROW_P + 4:ROW_P + 5, :C1]
    cb2  = slab_ref[ROW_P + 5:ROW_P + 6, :C2]
    g2   = slab_ref[ROW_P + 6:ROW_P + 7, :C2]
    b2   = slab_ref[ROW_P + 7:ROW_P + 8, :C2]
    w1e  = slab_ref[ROW_W1:ROW_W1 + K1 * IN_C, :C1 + C2]              # (K1*IN_C, C1+C2)

    # ---- BatchNorm1d(IN_C) statistics on the raw input ----
    scale0, shift0 = _bn_affine(x2d, g0, b0, 1.0 / (B * L))

    # ---- Conv1d #1 (stride S1, pad K1//2) as ONE im2col matmul.  BN0 is applied as a
    #      per-column affine; the static pmask1 keeps the zero-padded entries exactly 0.
    #      The nearest-neighbour CHANNEL upsample of the skip path is folded into
    #      w1e / cb1e so f and f_up come out of the same MXU push.  (f32 throughout.) ----
    scale0k = jnp.concatenate([scale0] * K1, axis=1)                   # (1, K1*IN_C)
    shift0k = jnp.concatenate([shift0] * K1, axis=1)
    a1 = a1_raw * scale0k + pmask1 * shift0k
    y1 = jnp.dot(a1, w1e, preferred_element_type=jnp.float32) + cb1e   # (R, C1+C2)
    f, f_up = y1[:, :C1], y1[:, C1:]

    # ---- BatchNorm1d(C1) + ReLU ----
    scale1, shift1 = _bn_affine(f, g1, b1, 1.0 / R)
    h1 = jnp.maximum(f * scale1 + shift1, 0.0)                         # (R, C1)

    # ---- Conv1d #2 (stride 1, pad K2//2): K2 rolled-tap matmuls.  Rolls ride the XLU
    #      slot; static slab-column masks zero batch-boundary / wrapped rows. ----
    w2_0 = slab_ref[ROW_W2 + 0 * C1:ROW_W2 + 1 * C1, :C2]
    w2_1 = slab_ref[ROW_W2 + 1 * C1:ROW_W2 + 2 * C1, :C2]
    w2_2 = slab_ref[ROW_W2 + 2 * C1:ROW_W2 + 3 * C1, :C2]
    h1_m = pltpu.roll(h1, 1, axis=0) * m2a          # tap 0 reads row l-1
    h1_p = pltpu.roll(h1, R - 1, axis=0) * m2b      # tap 2 reads row l+1
    y2 = (jnp.dot(h1_m, w2_0, preferred_element_type=jnp.float32)
          + jnp.dot(h1, w2_1, preferred_element_type=jnp.float32)
          + jnp.dot(h1_p, w2_2, preferred_element_type=jnp.float32)
          + cb2)                                                       # (R, C2)

    # ---- BatchNorm1d(C2) + ReLU + residual add with the upsampled skip ----
    scale2, shift2 = _bn_affine(y2, g2, b2, 1.0 / R)
    h2 = jnp.maximum(y2 * scale2 + shift2, 0.0)
    out_ref[...] = (h2 + f_up).astype(out_ref.dtype)


# -------------------- one-time parameter packing (hoisted out of per-call path) --------------------
def pack_static_slab(params):
    """Pack BN/conv parameters and both conv weights into the static slab rows.
    Call ONCE per parameter set."""
    # PyTorch (C_out, C_in, k) -> im2col layout (k*C_in, C_out)
    w1_2d = jnp.transpose(params["w1"], (2, 1, 0)).reshape(K1 * IN_C, C1)
    w2_2d = jnp.transpose(params["w2"], (2, 1, 0)).reshape(K2 * C1, C2)
    # F.interpolate(f.transpose(-1,-2), size=C2) (mode='nearest') resamples the CHANNEL
    # axis C1 -> C2: dst j reads src floor(j*C1/C2).  Fold into conv1's weight/bias.
    src = (np.arange(C2) * C1) // C2
    w1e = jnp.concatenate([w1_2d, w1_2d[:, src]], axis=1)              # (K1*IN_C, C1+C2)
    cb1e = jnp.concatenate([params["cb1"], params["cb1"][src]])        # (C1+C2,)

    def row(v):
        v = jnp.asarray(v, jnp.float32).reshape(1, -1)
        return jnp.pad(v, ((0, 0), (0, W - v.shape[1])))

    prow = jnp.concatenate(
        [row(params["g0"]), row(params["b0"]), row(cb1e),
         row(params["g1"]), row(params["b1"]), row(params["cb2"]),
         row(params["g2"]), row(params["b2"])], axis=0)                # (8, W)
    w1_rows = jnp.pad(w1e, ((0, 16 - K1 * IN_C), (0, W - (C1 + C2))))  # (16, W)
    w2_rows = jnp.pad(w2_2d, ((0, 0), (0, W - C2)))                    # (K2*C1, W)
    return jnp.concatenate([prow, w1_rows, w2_rows], axis=0)           # (NROWS - ROW_P, W)


# --------------------------------------- wrapper ---------------------------------------
def multi_scale_patching(x_ncl, static_slab):
    """Forward of MultiScalePatching.  x_ncl: (B, IN_C, L) (PyTorch NCL layout).
    static_slab: output of pack_static_slab(params), precomputed once."""
    x = jnp.transpose(x_ncl, (0, 2, 1)).astype(jnp.float32)            # (B, L, IN_C)
    x_rows = jnp.pad(x.reshape(B * L, IN_C), ((0, 0), (0, W - IN_C)))  # (B*L, W)

    # stride-S1 zero-padded im2col of the RAW input (pure index plumbing; the
    # data-dependent BN affine is applied to it inside the kernel).
    xpad = jnp.pad(x, ((0, 0), (P1, P1), (0, 0)))
    taps = [xpad[:, t:t + S1 * (L1 - 1) + 1:S1, :] for t in range(K1)]
    a1_raw = jnp.concatenate(taps, axis=-1).reshape(R, K1 * IN_C)      # (R, K1*IN_C)
    a1_rows = jnp.concatenate([a1_raw, jnp.asarray(A1_MASK_NP)], axis=1)   # (R, W)

    # single packed slab -> single input DMA
    slab = jnp.concatenate([x_rows, a1_rows, static_slab], axis=0)     # (NROWS, W)

    out2d = pl.pallas_call(
        msp_kernel,
        out_shape=jax.ShapeDtypeStruct((R, C2), jnp.float32),
        grid_spec=pltpu.PrefetchScalarGridSpec(
            num_scalar_prefetch=0,
            grid=(1,),
            in_specs=[pl.BlockSpec((NROWS, W), lambda i: (0, 0))],
            out_specs=pl.BlockSpec((R, C2), lambda i: (0, 0)),
        ),
        # TODO(synk): if B/L scale past toy size, add a "parallel" batch/length grid axis
        # (v7x megacore), re-derive tiling against v7x's 64 MiB VMEM (set vmem_limit_bytes),
        # and accumulate BatchNorm statistics across grid steps; with grid=(1,) the
        # in-kernel full-tensor statistics are exact.
        compiler_params=pltpu.CompilerParams(dimension_semantics=("arbitrary",)),
    )(slab)

    # (R, C2) -> (B, C2, L2), matching PyTorch's NCL output.  At 1 KB this relayout is
    # accepted overhead; a consumer taking (B, L, C) could drop it.
    return jnp.transpose(out2d.reshape(B, L2, C2), (0, 2, 1))


# ----------------------------------------- main -----------------------------------------
if __name__ == "__main__":
    key = jax.random.PRNGKey(0)
    k_x, k_w1, k_b1, k_w2, k_b2 = jax.random.split(key, 5)

    x = jax.random.normal(k_x, (B, IN_C, L), jnp.float32)

    params = dict(
        # BatchNorm affine params (nn.BatchNorm1d defaults: gamma=1, beta=0)
        g0=jnp.ones((IN_C,), jnp.float32), b0=jnp.zeros((IN_C,), jnp.float32),
        g1=jnp.ones((C1,), jnp.float32), b1=jnp.zeros((C1,), jnp.float32),
        g2=jnp.ones((C2,), jnp.float32), b2=jnp.zeros((C2,), jnp.float32),
        # Conv1d weights/biases in PyTorch layout (C_out, C_in, k), deterministic
        w1=0.1 * jax.random.normal(k_w1, (C1, IN_C, K1), jnp.float32),
        cb1=0.1 * jax.random.normal(k_b1, (C1,), jnp.float32),
        w2=0.1 * jax.random.normal(k_w2, (C2, C1, K2), jnp.float32),
        cb2=0.1 * jax.random.normal(k_b2, (C2,), jnp.float32),
    )

    static_slab = pack_static_slab(params)          # hoisted: once per parameter set
    fwd = jax.jit(multi_scale_patching)

    out = fwd(x, static_slab)
    jax.block_until_ready(out)
    assert out.shape == (B, C2, L2) and out.dtype == jnp.float32
    print("KERNEL_OK")
</pallas_src>

<mosaic_0001>
module attributes {stable_mosaic.version = 11 : i64} {
  func.func @msp_kernel(%arg0: i32, %arg1: memref<96x32xf32, #tpu.memory_space<vmem>>, %arg2: memref<16x16xf32, #tpu.memory_space<vmem>>) attributes {dimension_semantics = [#tpu.dimension_semantics<arbitrary>], iteration_bounds = array<i64: 1>, scalar_prefetch = 0 : i64, scratch_operands = 0 : i64, tpu.core_type = #tpu.core_type<tc>, window_params = [{pipeline_mode = #tpu.pipeline_mode<synchronous>, transform_indices = @transform_0, window_bounds = array<i64: 96, 32>}, {pipeline_mode = #tpu.pipeline_mode<synchronous>, transform_indices = @transform_1, window_bounds = array<i64: 16, 16>}]} {
    %c0 = arith.constant 0 : index
    %c0_0 = arith.constant 0 : index
    %0 = vector.load %arg1[%c0, %c0_0] : memref<96x32xf32, #tpu.memory_space<vmem>>, vector<32x4xf32>
    %c32 = arith.constant 32 : index
    %c0_1 = arith.constant 0 : index
    %1 = vector.load %arg1[%c32, %c0_1] : memref<96x32xf32, #tpu.memory_space<vmem>>, vector<16x12xf32>
    %c32_2 = arith.constant 32 : index
    %c12 = arith.constant 12 : index
    %2 = vector.load %arg1[%c32_2, %c12] : memref<96x32xf32, #tpu.memory_space<vmem>>, vector<16x12xf32>
    %c32_3 = arith.constant 32 : index
    %c24 = arith.constant 24 : index
    %3 = vector.load %arg1[%c32_3, %c24] : memref<96x32xf32, #tpu.memory_space<vmem>>, vector<16x1xf32>
    %c32_4 = arith.constant 32 : index
    %c25 = arith.constant 25 : index
    %4 = vector.load %arg1[%c32_4, %c25] : memref<96x32xf32, #tpu.memory_space<vmem>>, vector<16x1xf32>
    %c48 = arith.constant 48 : index
    %c0_5 = arith.constant 0 : index
    %5 = vector.load %arg1[%c48, %c0_5] : memref<96x32xf32, #tpu.memory_space<vmem>>, vector<1x4xf32>
    %c49 = arith.constant 49 : index
    %c0_6 = arith.constant 0 : index
    %6 = vector.load %arg1[%c49, %c0_6] : memref<96x32xf32, #tpu.memory_space<vmem>>, vector<1x4xf32>
    %c50 = arith.constant 50 : index
    %c0_7 = arith.constant 0 : index
    %7 = vector.load %arg1[%c50, %c0_7] : memref<96x32xf32, #tpu.memory_space<vmem>>, vector<1x24xf32>
    %c51 = arith.constant 51 : index
    %c0_8 = arith.constant 0 : index
    %8 = vector.load %arg1[%c51, %c0_8] : memref<96x32xf32, #tpu.memory_space<vmem>>, vector<1x8xf32>
    %c52 = arith.constant 52 : index
    %c0_9 = arith.constant 0 : index
    %9 = vector.load %arg1[%c52, %c0_9] : memref<96x32xf32, #tpu.memory_space<vmem>>, vector<1x8xf32>
    %c53 = arith.constant 53 : index
    %c0_10 = arith.constant 0 : index
    %10 = vector.load %arg1[%c53, %c0_10] : memref<96x32xf32, #tpu.memory_space<vmem>>, vector<1x16xf32>
    %c54 = arith.constant 54 : index
    %c0_11 = arith.constant 0 : index
    %11 = vector.load %arg1[%c54, %c0_11] : memref<96x32xf32, #tpu.memory_space<vmem>>, vector<1x16xf32>
    %c55 = arith.constant 55 : index
    %c0_12 = arith.constant 0 : index
    %12 = vector.load %arg1[%c55, %c0_12] : memref<96x32xf32, #tpu.memory_space<vmem>>, vector<1x16xf32>
    %c56 = arith.constant 56 : index
    %c0_13 = arith.constant 0 : index
    %13 = vector.load %arg1[%c56, %c0_13] : memref<96x32xf32, #tpu.memory_space<vmem>>, vector<12x24xf32>
    %cst = arith.constant dense<0.000000e+00> : vector<4xf32>
    %14 = vector.multi_reduction <add>, %0, %cst [0] : vector<32x4xf32> to vector<4xf32>
    %15 = vector.shape_cast %14 : vector<4xf32> to vector<1x4xf32>
    %cst_14 = arith.constant 3.125000e-02 : f32
    %16 = vector.broadcast %cst_14 : f32 to vector<1x4xf32>
    %17 = arith.mulf %15, %16 : vector<1x4xf32>
    %18 = vector.broadcast %17 : vector<1x4xf32> to vector<32x4xf32>
    %19 = arith.subf %0, %18 : vector<32x4xf32>
    %20 = arith.mulf %19, %19 : vector<32x4xf32>
    %cst_15 = arith.constant dense<0.000000e+00> : vector<4xf32>
    %21 = vector.multi_reduction <add>, %20, %cst_15 [0] : vector<32x4xf32> to vector<4xf32>
    %22 = vector.shape_cast %21 : vector<4xf32> to vector<1x4xf32>
    %cst_16 = arith.constant 3.125000e-02 : f32
    %23 = vector.broadcast %cst_16 : f32 to vector<1x4xf32>
    %24 = arith.mulf %22, %23 : vector<1x4xf32>
    %cst_17 = arith.constant 9.99999974E-6 : f32
    %25 = vector.broadcast %cst_17 : f32 to vector<1x4xf32>
    %26 = arith.addf %24, %25 : vector<1x4xf32>
    %27 = math.rsqrt %26 : vector<1x4xf32>
    %28 = arith.mulf %27, %5 : vector<1x4xf32>
    %29 = arith.mulf %17, %28 : vector<1x4xf32>
    %30 = arith.subf %6, %29 : vector<1x4xf32>
    %31 = tpu.concatenate %28, %28, %28 in 1 : vector<1x4xf32>, vector<1x4xf32>, vector<1x4xf32> -> vector<1x12xf32>
    %32 = tpu.concatenate %30, %30, %30 in 1 : vector<1x4xf32>, vector<1x4xf32>, vector<1x4xf32> -> vector<1x12xf32>
    %33 = vector.broadcast %31 : vector<1x12xf32> to vector<16x12xf32>
    %34 = arith.mulf %1, %33 : vector<16x12xf32>
    %35 = vector.broadcast %32 : vector<1x12xf32> to vector<16x12xf32>
    %36 = arith.mulf %2, %35 : vector<16x12xf32>
    %37 = arith.addf %34, %36 : vector<16x12xf32>
    %cst_18 = arith.constant dense<0.000000e+00> : vector<16x24xf32>
    %38 = tpu.matmul %37, %13, %cst_18 {dimension_numbers = #tpu.dot_dimension_numbers<[1], [0], [0], [1], [0, 0, 1, 1], [], []>} : vector<16x12xf32>, vector<12x24xf32>, vector<16x24xf32> -> vector<16x24xf32>
    %39 = vector.broadcast %7 : vector<1x24xf32> to vector<16x24xf32>
    %40 = arith.addf %38, %39 : vector<16x24xf32>
    %41 = vector.extract_strided_slice %40 {offsets = [0, 0], sizes = [16, 8], strides = [1, 1]} : vector<16x24xf32> to vector<16x8xf32>
    %42 = vector.extract_strided_slice %40 {offsets = [0, 8], sizes = [16, 16], strides = [1, 1]} : vector<16x24xf32> to vector<16x16xf32>
    %cst_19 = arith.constant dense<0.000000e+00> : vector<8xf32>
    %43 = vector.multi_reduction <add>, %41, %cst_19 [0] : vector<16x8xf32> to vector<8xf32>
    %44 = vector.shape_cast %43 : vector<8xf32> to vector<1x8xf32>
    %cst_20 = arith.constant 6.250000e-02 : f32
    %45 = vector.broadcast %cst_20 : f32 to vector<1x8xf32>
    %46 = arith.mulf %44, %45 : vector<1x8xf32>
    %47 = vector.broadcast %46 : vector<1x8xf32> to vector<16x8xf32>
    %48 = arith.subf %41, %47 : vector<16x8xf32>
    %49 = arith.mulf %48, %48 : vector<16x8xf32>
    %cst_21 = arith.constant dense<0.000000e+00> : vector<8xf32>
    %50 = vector.multi_reduction <add>, %49, %cst_21 [0] : vector<16x8xf32> to vector<8xf32>
    %51 = vector.shape_cast %50 : vector<8xf32> to vector<1x8xf32>
    %cst_22 = arith.constant 6.250000e-02 : f32
    %52 = vector.broadcast %cst_22 : f32 to vector<1x8xf32>
    %53 = arith.mulf %51, %52 : vector<1x8xf32>
    %cst_23 = arith.constant 9.99999974E-6 : f32
    %54 = vector.broadcast %cst_23 : f32 to vector<1x8xf32>
    %55 = arith.addf %53, %54 : vector<1x8xf32>
    %56 = math.rsqrt %55 : vector<1x8xf32>
    %57 = arith.mulf %56, %8 : vector<1x8xf32>
    %58 = arith.mulf %46, %57 : vector<1x8xf32>
    %59 = arith.subf %9, %58 : vector<1x8xf32>
    %60 = vector.broadcast %57 : vector<1x8xf32> to vector<16x8xf32>
    %61 = arith.mulf %41, %60 : vector<16x8xf32>
    %62 = vector.broadcast %59 : vector<1x8xf32> to vector<16x8xf32>
    %63 = arith.addf %61, %62 : vector<16x8xf32>
    %cst_24 = arith.constant 0.000000e+00 : f32
    %64 = vector.broadcast %cst_24 : f32 to vector<16x8xf32>
    %65 = arith.maximumf %63, %64 : vector<16x8xf32>
    %c72 = arith.constant 72 : index
    %c0_25 = arith.constant 0 : index
    %66 = vector.load %arg1[%c72, %c0_25] : memref<96x32xf32, #tpu.memory_space<vmem>>, vector<8x16xf32>
    %c80 = arith.constant 80 : index
    %c0_26 = arith.constant 0 : index
    %67 = vector.load %arg1[%c80, %c0_26] : memref<96x32xf32, #tpu.memory_space<vmem>>, vector<8x16xf32>
    %c88 = arith.constant 88 : index
    %c0_27 = arith.constant 0 : index
    %68 = vector.load %arg1[%c88, %c0_27] : memref<96x32xf32, #tpu.memory_space<vmem>>, vector<8x16xf32>
    %c1_i32 = arith.constant 1 : i32
    %69 = tpu.dynamic_rotate %65 by %c1_i32 dim 0 : vector<16x8xf32>, i32 -> vector<16x8xf32>
    %70 = vector.broadcast %3 : vector<16x1xf32> to vector<16x8xf32>
    %71 = arith.mulf %69, %70 : vector<16x8xf32>
    %c15_i32 = arith.constant 15 : i32
    %72 = tpu.dynamic_rotate %65 by %c15_i32 dim 0 : vector<16x8xf32>, i32 -> vector<16x8xf32>
    %73 = vector.broadcast %4 : vector<16x1xf32> to vector<16x8xf32>
    %74 = arith.mulf %72, %73 : vector<16x8xf32>
    %cst_28 = arith.constant dense<0.000000e+00> : vector<16x16xf32>
    %75 = tpu.matmul %71, %66, %cst_28 {dimension_numbers = #tpu.dot_dimension_numbers<[1], [0], [0], [1], [0, 0, 1, 1], [], []>} : vector<16x8xf32>, vector<8x16xf32>, vector<16x16xf32> -> vector<16x16xf32>
    %cst_29 = arith.constant dense<0.000000e+00> : vector<16x16xf32>
    %76 = tpu.matmul %65, %67, %cst_29 {dimension_numbers = #tpu.dot_dimension_numbers<[1], [0], [0], [1], [0, 0, 1, 1], [], []>} : vector<16x8xf32>, vector<8x16xf32>, vector<16x16xf32> -> vector<16x16xf32>
    %77 = arith.addf %75, %76 : vector<16x16xf32>
    %cst_30 = arith.constant dense<0.000000e+00> : vector<16x16xf32>
    %78 = tpu.matmul %74, %68, %cst_30 {dimension_numbers = #tpu.dot_dimension_numbers<[1], [0], [0], [1], [0, 0, 1, 1], [], []>} : vector<16x8xf32>, vector<8x16xf32>, vector<16x16xf32> -> vector<16x16xf32>
    %79 = arith.addf %77, %78 : vector<16x16xf32>
    %80 = vector.broadcast %10 : vector<1x16xf32> to vector<16x16xf32>
    %81 = arith.addf %79, %80 : vector<16x16xf32>
    %cst_31 = arith.constant dense<0.000000e+00> : vector<16xf32>
    %82 = vector.multi_reduction <add>, %81, %cst_31 [0] : vector<16x16xf32> to vector<16xf32>
    %83 = vector.shape_cast %82 : vector<16xf32> to vector<1x16xf32>
    %cst_32 = arith.constant 6.250000e-02 : f32
    %84 = vector.broadcast %cst_32 : f32 to vector<1x16xf32>
    %85 = arith.mulf %83, %84 : vector<1x16xf32>
    %86 = vector.broadcast %85 : vector<1x16xf32> to vector<16x16xf32>
    %87 = arith.subf %81, %86 : vector<16x16xf32>
    %88 = arith.mulf %87, %87 : vector<16x16xf32>
    %cst_33 = arith.constant dense<0.000000e+00> : vector<16xf32>
    %89 = vector.multi_reduction <add>, %88, %cst_33 [0] : vector<16x16xf32> to vector<16xf32>
    %90 = vector.shape_cast %89 : vector<16xf32> to vector<1x16xf32>
    %cst_34 = arith.constant 6.250000e-02 : f32
    %91 = vector.broadcast %cst_34 : f32 to vector<1x16xf32>
    %92 = arith.mulf %90, %91 : vector<1x16xf32>
    %cst_35 = arith.constant 9.99999974E-6 : f32
    %93 = vector.broadcast %cst_35 : f32 to vector<1x16xf32>
    %94 = arith.addf %92, %93 : vector<1x16xf32>
    %95 = math.rsqrt %94 : vector<1x16xf32>
    %96 = arith.mulf %95, %11 : vector<1x16xf32>
    %97 = arith.mulf %85, %96 : vector<1x16xf32>
    %98 = arith.subf %12, %97 : vector<1x16xf32>
    %99 = vector.broadcast %96 : vector<1x16xf32> to vector<16x16xf32>
    %100 = arith.mulf %81, %99 : vector<16x16xf32>
    %101 = vector.broadcast %98 : vector<1x16xf32> to vector<16x16xf32>
    %102 = arith.addf %100, %101 : vector<16x16xf32>
    %cst_36 = arith.constant 0.000000e+00 : f32
    %103 = vector.broadcast %cst_36 : f32 to vector<16x16xf32>
    %104 = arith.maximumf %102, %103 : vector<16x16xf32>
    %105 = arith.addf %104, %42 : vector<16x16xf32>
    %c0_37 = arith.constant 0 : index
    %c0_38 = arith.constant 0 : index
    %106 = vector.load %arg2[%c0_37, %c0_38] : memref<16x16xf32, #tpu.memory_space<vmem>>, vector<16x16xf32>
    tpu.vector_store %arg2[%c0_37, %c0_38], %105 {strides = array<i32>} : memref<16x16xf32, #tpu.memory_space<vmem>>, vector<16x16xf32>,
    return
  }
  func.func @transform_0(%arg0: i32) -> (i32, i32) {
    %c0_i32 = arith.constant 0 : i32
    %c0_i32_0 = arith.constant 0 : i32
    %c0_i32_1 = arith.constant 0 : i32
    return %c0_i32, %c0_i32_0 : i32, i32
  }
  func.func @transform_1(%arg0: i32) -> (i32, i32) {
    %c0_i32 = arith.constant 0 : i32
    %c0_i32_0 = arith.constant 0 : i32
    %c0_i32_1 = arith.constant 0 : i32
    return %c0_i32, %c0_i32_0 : i32, i32
  }
}

</mosaic_0001>

<bundles_post_ra>
// kernel: multi_scale_patching.1
= control target key start
LH: loop header
LB: loop body
LE: loop exit
PB: predicated region body
PF: predicated region fallthrough
CT: control target
= control target key end

     0   :  { %vm25_vm0 = vcmask 31744   ;;  %s842_s0 = inlined_call_operand.vmem [shape: f32[96,32], index: 0, kind: input, shape index: {}]   ;;  %s843_s1 = inlined_call_operand.hbm [shape: f32[16,16], index: 1, kind: output, shape index: {}]  }
   0x1   :  { %v9_v0 = vld [vmem:[%s842_s0] sm:$0xff]  ;;  %v10_v1 = vld [vmem:[%s842_s0 + $0x8] sm:$0xff]  ;;  %v11_v2 = vld [vmem:[%s842_s0 + $0x10] sm:$0xff] }
   0x2   :  { %v12_v3 = vld [vmem:[%s842_s0 + $0x18] sm:$0xff]  ;;  %v26_v4 = vsel %vm25_vm0, %v9_v0, 0.0  ;;  %v27_v5 = vsel %vm25_vm0, %v10_v1, 0.0  ;;  %v29_v6 = vsel %vm25_vm0, %v11_v2, 0.0 }
   0x3   :  { %6 = vsyncpa [#allocation3], 0  ;;  %v28_v7 = vadd.f32 %v27_v5, %v26_v4  ;;  %v31_v8 = vsel %vm25_vm0, %v12_v3, 0.0  ;;  %v15_v41 = vld [vmem:[%s842_s0 + $0x30] sm:$0x1]  ;;  %s705_s18 = smov 4   ;;  %v86_v47 = vlaneseq }
   0x4   :  { %v16_v44 = vld [vmem:[%s842_s0 + $0x31] sm:$0x1]  ;;  %s706_s19 = smov 8   ;;  %v23_v50 = vld [vmem:[%s842_s0 + $0x38] sm:$0xff]  ;;  %v24_v51 = vld [vmem:[%s842_s0 + $0x40] sm:$0xf] }
   0x5   :  { %v30_v9 = vadd.f32 %v29_v6, %v28_v7  ;;  %v753_v48 = vshrl.u32 %v86_v47, 7  ;;  %vm123_vm1 = vcmask 1043456   ;;  %vm75_vm2 = vcmask 64512   ;;  %s708_s24 = smov 12   ;;  %v13_v59 = vld [vmem:[%s842_s0 + $0x20] sm:$0xff]  ;;  %v14_v60 = vld [vmem:[%s842_s0 + $0x28] sm:$0xff] }
   0x6   :  { %v651_v53 = vpack.c.bf16 %v24_v51, %v23_v50  ;;  %vm707_vm3 = vmmov 1   ;;  %v709_v58 = vmov 24   ;;  %s710_s29 = smov 116   ;;  %vm116_vm5 = vcmask 97280   ;;  %s712_s9 = smov 120  }
   0x7   :  { %v32_v10 = vadd.f32 %v31_v8, %v30_v9  ;;  %v762_v52 = vsub.s32 0, %v753_v48  ;;  %vm652_vm4 = vmpackc.low %vm123_vm1, %vm707_vm3  ;;  %671 = vset.pattern.permute.xlu1 %v709_v58  ;;  %672 = vset.pattern.permute.xlu0 %v709_v58  ;;  %vm252_vm6 = vcmp.lt.s32.totalorder %v753_v48, 1  ;;  %vm269_vm7 = vcmp.lt.s32.totalorder %v753_v48, 7  ;;  %s713_s21 = smov [#allocation2]  }
   0x8   :  { %653 = vmatprep.subr.msk.bf16.mxu0 %vm652_vm4, %v651_v53  ;;  %vm533_vm8 = vcmask 130048   ;;  %s594_s22 = sshll.u32 %s713_s21, 4  ;;  %s595_s22 = int_to_ptr.vmem [resolvable:$true] %s594_s22 }
   0x9   :  { %v33_v11 = vrot.slane %v32_v10, 4  ;;  %656 = vmatpush3.bf16.msk.msra.mxu0 %vm652_vm4, %v651_v53  ;;  %p686_p1 = scmp.lt.s32.totalorder %s595_s22, %s595_s22 }
   0xb   :  { %v34_v12 = vadd.f32 %v33_v11, %v32_v10 }
   0xd   :  { %v35_v13 = vrot.slane %v34_v12, 2 }
   0xf   :  { %v36_v14 = vadd.f32 %v35_v13, %v34_v12  ;;  %v246_v12 = vld [vmem:[%s842_s0 + $0x50] sm:$0xff]  ;;  %v245_v13 = vld [vmem:[%s842_s0 + $0x48] sm:$0xff] }
  0x10   :  { %636 = vmatprep.subr.mxu0 %v246_v12  ;;  %641 = vmatprep.subr.mxu1 %v245_v13 }
  0x11   :  { %v37_v15 = vrot.slane %v36_v14, 1  ;;  %642 = vmatpush3.msra.mxu1 %v245_v13 }
  0x13   :  { %v38_v16 = vadd.f32 %v37_v15, %v36_v14  ;;  %v785_v14 = vld [vmem:[%s842_s0 + $0x58] sm:$0xff]  ;;  %v605_v15 = vld [vmem:[%s842_s0 + $0x32] ss:$0 sm:$0xff] }
  0x14   :  { %646 = vmatprep.subr.mxu1 %v785_v14 }
  0x15   :  { %v39_v17 = vmul.f32 0.03125, %v38_v16 }
  0x17   :  { %v40_v18 = vsub.f32 %v9_v0, %v39_v17  ;;  %v41_v19 = vsub.f32 %v10_v1, %v39_v17  ;;  %v42_v20 = vsub.f32 %v11_v2, %v39_v17  ;;  %v43_v21 = vsub.f32 %v12_v3, %v39_v17 }
  0x18   :  { %v711_v0 = vmov 25  }
  0x19   :  { %v44_v22 = vmul.f32 %v40_v18, %v40_v18  ;;  %v45_v23 = vmul.f32 %v41_v19, %v41_v19  ;;  %v46_v24 = vmul.f32 %v42_v20, %v42_v20  ;;  %v47_v25 = vmul.f32 %v43_v21, %v43_v21 }
  0x1b   :  { %v48_v26 = vsel %vm25_vm0, %v44_v22, 0.0  ;;  %v49_v27 = vsel %vm25_vm0, %v45_v23, 0.0  ;;  %v51_v28 = vsel %vm25_vm0, %v46_v24, 0.0  ;;  %v53_v30 = vsel %vm25_vm0, %v47_v25, 0.0 }
  0x1c   :  { %v50_v29 = vadd.f32 %v49_v27, %v48_v26 }
  0x1e   :  { %v52_v31 = vadd.f32 %v51_v28, %v50_v29 }
  0x20   :  { %v54_v32 = vadd.f32 %v53_v30, %v52_v31 }
  0x22   :  { %v55_v33 = vrot.slane %v54_v32, 4 }
  0x24   :  { %v56_v34 = vadd.f32 %v55_v33, %v54_v32 }
  0x26   :  { %v57_v35 = vrot.slane %v56_v34, 2 }
  0x28   :  { %v58_v36 = vadd.f32 %v57_v35, %v56_v34 }
  0x2a   :  { %v59_v37 = vrot.slane %v58_v36, 1 }
  0x2c   :  { %v60_v38 = vadd.f32 %v59_v37, %v58_v36 }
  0x2e   :  { %v61_v39 = vmul.f32 0.03125, %v60_v38 }
  0x30   :  { %v62_v40 = vadd.f32 1e-05, %v61_v39 }
  0x32   :  { %675 = vrsqrt.f32 %v62_v40 }
  0x3c   :  { %v676_v42 = vpop.eup %675 }
  0x3d   :  { %v64_v43 = vmul.f32 %v676_v42, %v15_v41 }
  0x3f   :  { %v65_v45 = vmul.f32 %v64_v43, %v39_v17 }
  0x41   :  { %v66_v46 = vsub.f32 %v16_v44, %v65_v45  ;;  %v18_v45 = vld [vmem:[%s842_s0 + $0x33] sm:$0x1] }
  0x43   :  { %78 = vrot.lane.b32.xlu0 %v66_v46, %s705_s18 }
  0x47   :  { %81 = vrot.lane.b32.xlu0 %v66_v46, %s706_s19 }
  0x4b   :  { %71 = vrot.lane.b32.xlu0 %v64_v43, %s706_s19 }
  0xb5   :  { %v79_v49 = vpop.permute.xlu0 %78 }
  0xb6   :  { %v84_v54 = vsel %vm25_vm0, %v66_v46, %v79_v49  ;;  %v19_v49 = vld [vmem:[%s842_s0 + $0x34] sm:$0x1] }
  0xb9   :  { %v82_v55 = vpop.permute.xlu0 %81 }
  0xba   :  { %v85_v56 = vsel %vm75_vm2, %v84_v54, %v82_v55 }
  0xbb   :  { %v95_v57 = vrot.slane %v85_v56, %v762_v52 }
  0xbd   :  { %97 = vrot.lane.b32.xlu1 %v95_v57, %s708_s24  ;;  %v72_v3 = vpop.permute.xlu0 %71 }
  0xc1   :  { %68 = vrot.lane.b32.xlu1 %v64_v43, %s705_s18 }
 0x12f   :  { %v98_v61 = vpop.permute.xlu1 %97 }
 0x130   :  { %v100_v62 = vmul.f32 %v98_v61, %v13_v59  ;;  %v101_v63 = vmul.f32 %v98_v61, %v14_v60 }
 0x132   :  { %106 = vrot.lane.b32.xlu0 %v101_v63, %s710_s29  ;;  %104 = vrot.lane.b32.xlu1 %v100_v62, %s710_s29 }
 0x133   :  { %v69_v1 = vpop.permute.xlu1 %68 }
 0x134   :  { %v74_v2 = vsel %vm25_vm0, %v64_v43, %v69_v1 }
 0x135   :  { %v76_v4 = vsel %vm75_vm2, %v74_v2, %v72_v3 }
 0x136   :  { %257 = vperm.xlu1 %671, %v13_v59   ;;  %262 = vperm.xlu0 %672, %v14_v60   ;;  %v89_v5 = vrot.slane %v76_v4, %v762_v52 }
 0x138   :  { %v90_v6 = vmul.f32 %v89_v5, %v13_v59  ;;  %v91_v7 = vmul.f32 %v89_v5, %v14_v60 }
 0x13a   :  { %673 = vset.pattern.permute.xlu1 %v711_v0  ;;  %674 = vset.pattern.permute.xlu0 %v711_v0 }
 0x13b   :  { %273 = vperm.xlu1 %673, %v13_v59  }
 0x13f   :  { %277 = vperm.xlu1 %673, %v14_v60  }
 0x1a4   :  { %v105_v8 = vpop.permute.xlu1 %104  ;;  %v107_v9 = vpop.permute.xlu0 %106 }
 0x1a5   :  { %v110_v10 = vadd.f32 %v105_v8, %v90_v6  ;;  %v111_v11 = vadd.f32 %v107_v9, %v91_v7 }
 0x1a7   :  { %633 = vmatprep.mubr.msk.f32.mxu0 %vm116_vm5, %v110_v10 }
 0x1a8   :  { %634 = vmatmul.mubr.msk.f32.vlgmr.msra.gmra.mrb[0].mxu0 %vm116_vm5, %v111_v11 }
 0x1a9   :  { %637 = vmatpush3.msra.mxu0 %v246_v12 }
 0x1b5   :  { %v258_v59 = vpop.permute.xlu1 %257  ;;  %v263_v2 = vpop.permute.xlu0 %262 }
 0x1ba   :  { %v274_v8 = vpop.permute.xlu1 %273 }
 0x1be   :  { %v278_v48 = vpop.permute.xlu1 %277 }
 0x27b   :  { %v635_v16 = vpop.f32.mrb[0].mxu0 }
 0x27c   :  { %v199_v17 = vadd.f32 %v635_v16, %v605_v15  ;;  %v193_v18 = vpop.f32.mrb[1].mxu0 }
 0x27d   :  { %v194_v19 = vadd.f32 %v605_v15, %v193_v18  ;;  %v615_v15 = vld [vmem:[%s842_s0 + $0x35] ss:$0 sm:$0xff] }
 0x27e   :  { %v203_v20 = vsel %vm75_vm2, %v199_v17, 0.0  ;;  %581 = vrot.lane.b32.xlu1 %v199_v17, %s712_s9 }
 0x27f   :  { %v202_v21 = vsel %vm75_vm2, %v194_v19, 0.0  ;;  %579 = vrot.lane.b32.xlu0 %v194_v19, %s712_s9 }
 0x280   :  { %v204_v22 = vadd.f32 %v203_v20, %v202_v21 }
 0x282   :  { %v205_v23 = vrot.slane %v204_v22, 4 }
 0x284   :  { %v206_v24 = vadd.f32 %v205_v23, %v204_v22 }
 0x286   :  { %v207_v25 = vrot.slane %v206_v24, 2 }
 0x288   :  { %v208_v26 = vadd.f32 %v207_v25, %v206_v24 }
 0x28a   :  { %v209_v27 = vrot.slane %v208_v26, 1 }
 0x28c   :  { %v210_v28 = vadd.f32 %v209_v27, %v208_v26 }
 0x28e   :  { %v211_v29 = vmul.f32 0.0625, %v210_v28 }
 0x290   :  { %v212_v30 = vsub.f32 %v194_v19, %v211_v29  ;;  %v213_v31 = vsub.f32 %v199_v17, %v211_v29 }
 0x292   :  { %v214_v32 = vmul.f32 %v212_v30, %v212_v30  ;;  %v215_v33 = vmul.f32 %v213_v31, %v213_v31 }
 0x294   :  { %v216_v34 = vsel %vm75_vm2, %v214_v32, 0.0  ;;  %v217_v35 = vsel %vm75_vm2, %v215_v33, 0.0 }
 0x295   :  { %v218_v36 = vadd.f32 %v217_v35, %v216_v34 }
 0x297   :  { %v219_v37 = vrot.slane %v218_v36, 4 }
 0x299   :  { %v220_v38 = vadd.f32 %v219_v37, %v218_v36 }
 0x29b   :  { %v221_v39 = vrot.slane %v220_v38, 2 }
 0x29d   :  { %v222_v40 = vadd.f32 %v221_v39, %v220_v38 }
 0x29f   :  { %v223_v41 = vrot.slane %v222_v40, 1 }
 0x2a1   :  { %v224_v42 = vadd.f32 %v223_v41, %v222_v40 }
 0x2a3   :  { %v225_v43 = vmul.f32 0.0625, %v224_v42 }
 0x2a5   :  { %v226_v44 = vadd.f32 1e-05, %v225_v43 }
 0x2a7   :  { %677 = vrsqrt.f32 %v226_v44 }
 0x2b1   :  { %v678_v46 = vpop.eup %677 }
 0x2b2   :  { %v228_v47 = vmul.f32 %v678_v46, %v18_v45  ;;  %v21_v46 = vld [vmem:[%s842_s0 + $0x36] sm:$0x1] }
 0x2b4   :  { %v229_v50 = vmul.f32 %v228_v47, %v211_v29  ;;  %v234_v51 = vrot.slane %v228_v47, %v762_v52 }
 0x2b6   :  { %v230_v53 = vsub.f32 %v19_v49, %v229_v50  ;;  %v235_v54 = vmul.f32 %v234_v51, %v194_v19  ;;  %v236_v55 = vmul.f32 %v234_v51, %v199_v17  ;;  %v22_v50 = vld [vmem:[%s842_s0 + $0x37] sm:$0x1]  ;;  %s681_s0 = scalar_lea.vmem %s595_s22, 256 }
 0x2b7   :  { %p682_p0 = scmp.ne.s32.totalorder %s595_s22, %s681_s0  ;;  %p687_p2 = scmp.lt.s32.totalorder %s681_s0, %s681_s0 }
 0x2b8   :  { %v240_v56 = vrot.slane %v230_v53, %v762_v52 }
 0x2b9   :  { %p688_p3 = por %p687_p2, %p686_p1 }
 0x2ba   :  { %v241_v57 = vadd.f32 %v240_v56, %v235_v54  ;;  %v242_v58 = vadd.f32 %v240_v56, %v236_v55 }
 0x2bb   :  { %p689_p4 = pnand %p688_p3, %p682_p0 }
 0x2bc   :  { %v243_v60 = vmax.f32 %v241_v57, 0.0  ;;  %v244_v61 = vmax.f32 %v242_v58, 0.0 }
 0x2be   :  { %v248_v62 = vrot.slane %v243_v60, 7  ;;  %v249_v63 = vrot.slane %v244_v61, 7  ;;  %v267_v0 = vrot.slane %v243_v60, 1  ;;  %v268_v1 = vrot.slane %v244_v61, 1  ;;  %638 = vmatprep.mubr.msk.f32.mxu0 %vm75_vm2, %v243_v60 }
 0x2bf   :  { %639 = vmatmul.mubr.msk.f32.vlgmr.msra.gmra.mrb[2].mxu0 %vm75_vm2, %v244_v61 }
 0x2c0   :  { %v254_v3 = vsel %vm252_vm6, %v249_v63, %v248_v62  ;;  %v270_v4 = vsel %vm269_vm7, %v267_v0, %v268_v1  ;;  %v271_v5 = vsel %vm269_vm7, %v268_v1, %v267_v0  ;;  %v253_v6 = vsel %vm252_vm6, %v248_v62, %v249_v63 }
 0x2c1   :  { %v265_v7 = vmul.f32 %v258_v59, %v254_v3  ;;  %v266_v9 = vmul.f32 %v263_v2, %v253_v6  ;;  %v280_v10 = vmul.f32 %v274_v8, %v270_v4  ;;  %v281_v11 = vmul.f32 %v278_v48, %v271_v5 }
 0x2c3   :  { %643 = vmatprep.mubr.msk.f32.mxu1 %vm75_vm2, %v265_v7 }
 0x2c4   :  { %644 = vmatmul.mubr.msk.f32.vlgmr.msra.gmra.mrb[0].mxu1 %vm75_vm2, %v266_v9 }
 0x2c5   :  { %647 = vmatpush3.msra.mxu1 %v785_v14  ;;  %648 = vmatprep.mubr.msk.f32.mxu1 %vm75_vm2, %v280_v10 }
 0x2cc   :  { %649 = vmatmul.mubr.msk.f32.vlgmr.msra.gmra.mrb[0].mxu1 %vm75_vm2, %v281_v11 }
 0x2f0   :  { %v582_v62 = vpop.permute.xlu1 %581 }
 0x2f1   :  { %v580_v63 = vpop.permute.xlu0 %579 }
 0x392   :  { %v640_v12 = vpop.f32.mrb[2].mxu0 }
 0x393   :  { %v354_v13 = vpop.f32.mrb[3].mxu0 }
 0x39f   :  { %v650_v16 = vpop.f32.mrb[0].mxu1 }
 0x3a0   :  { %v657_v17 = vadd.f32 %v650_v16, %v640_v12  ;;  %v516_v18 = vpop.f32.mrb[1].mxu1 }
 0x3a1   :  { %v658_v19 = vadd.f32 %v516_v18, %v354_v13 }
 0x3a2   :  { %v532_v20 = vadd.f32 %v657_v17, %v615_v15 }
 0x3a3   :  { %v531_v21 = vadd.f32 %v658_v19, %v615_v15 }
 0x3a4   :  { %v535_v14 = vsel %vm533_vm8, %v532_v20, 0.0 }
 0x3a5   :  { %v534_v22 = vsel %vm533_vm8, %v531_v21, 0.0 }
 0x3a6   :  { %v536_v23 = vadd.f32 %v535_v14, %v534_v22 }
 0x3a8   :  { %v537_v24 = vrot.slane %v536_v23, 4 }
 0x3aa   :  { %v538_v25 = vadd.f32 %v537_v24, %v536_v23 }
 0x3ac   :  { %v539_v26 = vrot.slane %v538_v25, 2 }
 0x3ae   :  { %v540_v27 = vadd.f32 %v539_v26, %v538_v25 }
 0x3b0   :  { %v541_v28 = vrot.slane %v540_v27, 1 }
 0x3b2   :  { %v542_v29 = vadd.f32 %v541_v28, %v540_v27 }
 0x3b4   :  { %v543_v30 = vmul.f32 0.0625, %v542_v29 }
 0x3b6   :  { %v544_v31 = vsub.f32 %v531_v21, %v543_v30  ;;  %v545_v32 = vsub.f32 %v532_v20, %v543_v30 }
 0x3b8   :  { %v546_v33 = vmul.f32 %v544_v31, %v544_v31  ;;  %v547_v34 = vmul.f32 %v545_v32, %v545_v32 }
 0x3ba   :  { %v548_v35 = vsel %vm533_vm8, %v546_v33, 0.0  ;;  %v549_v36 = vsel %vm533_vm8, %v547_v34, 0.0 }
 0x3bb   :  { %v550_v37 = vadd.f32 %v549_v36, %v548_v35 }
 0x3bd   :  { %v551_v38 = vrot.slane %v550_v37, 4 }
 0x3bf   :  { %v552_v39 = vadd.f32 %v551_v38, %v550_v37 }
 0x3c1   :  { %v553_v40 = vrot.slane %v552_v39, 2 }
 0x3c3   :  { %v554_v41 = vadd.f32 %v553_v40, %v552_v39 }
 0x3c5   :  { %v555_v42 = vrot.slane %v554_v41, 1 }
 0x3c7   :  { %v556_v43 = vadd.f32 %v555_v42, %v554_v41 }
 0x3c9   :  { %v557_v44 = vmul.f32 0.0625, %v556_v43 }
 0x3cb   :  { %v558_v45 = vadd.f32 1e-05, %v557_v44 }
 0x3cd   :  { %679 = vrsqrt.f32 %v558_v45 }
 0x3d7   :  { %v680_v47 = vpop.eup %679 }
 0x3d8   :  { %v560_v49 = vmul.f32 %v680_v47, %v21_v46 }
 0x3da   :  { %v561_v51 = vmul.f32 %v560_v49, %v543_v30  ;;  %v566_v53 = vrot.slane %v560_v49, %v762_v52 }
 0x3dc   :  { %v562_v54 = vsub.f32 %v22_v50, %v561_v51  ;;  %v567_v55 = vmul.f32 %v566_v53, %v531_v21  ;;  %v568_v56 = vmul.f32 %v566_v53, %v532_v20 }
 0x3de   :  { %v572_v57 = vrot.slane %v562_v54, %v762_v52 }
 0x3e0   :  { %v573_v58 = vadd.f32 %v572_v57, %v567_v55  ;;  %v574_v59 = vadd.f32 %v572_v57, %v568_v56 }
 0x3e2   :  { %v575_v60 = vmax.f32 %v573_v58, 0.0  ;;  %v576_v61 = vmax.f32 %v574_v59, 0.0 }
 0x3e4   :  { %v585_v0 = vadd.f32 %v580_v63, %v575_v60  ;;  %v586_v1 = vadd.f32 %v582_v62, %v576_v61 }
 0x3e6   :  { %587 = vst.msk [vmem:[#allocation2] sm:$0xff] %vm533_vm8, %v585_v0  ;;  %588 = vst.msk [vmem:[#allocation2 + $0x8] sm:$0xff] %vm533_vm8, %v586_v1 }
 0x3e7   :  { %692 = shalt.err (!%p689_p4)
}
 0x3e8   :  { %s693_s25 = scalar_lea.hbm %s843_s1, 256 }
 0x3e9   :  { %p694_p5 = scmp.ne.s32.totalorder %s843_s1, %s693_s25  ;;  %p697_p6 = scmp.lt.u32.totalorder %s693_s25, %s843_s1 }
 0x3eb   :  { %p699_p7 = pnand %p697_p6, %p694_p5 }
 0x3ed   :  { %702 = shalt.err (!%p699_p7)
}
 0x3ee   :  { %s714_s30 = smov 128  }
 0x3ef   :  { %600 = dma.vmem_to_hbm [thread:$0]  %s595_s22, 256, %s843_s1, [#allocation3], %s714_s30, %s714_s30, %s706_s19  }
 0x3f0   :  { %703 = dma.done.wait [#allocation3], 256  }
 0x3f1   :  { %704 = vsyncadd [#allocation3], 4294967040 }
 0x3f2   :  { %604 = vsyncpa [#allocation3], 1 }

</bundles_post_ra>
